<compile_context>
chip_gen: v7x
topology: tpu7x:2x2x1
jax: 0.10.0
libtpu: 0.0.40
codegen_flags: <defaults>
</compile_context>

<pallas_src>
import functools

import jax
import jax.numpy as jnp
from jax.experimental import pallas as pl
from jax.experimental.pallas import tpu as pltpu

INPUT_DIM = 2
HIDDEN = 128
LN_EPS = 1e-5
LEAK = 0.2
MAX_TILE_B = 2048   # VMEM-safe tile ceiling on every generation (incl. v7x's 64 MiB VMEM)


def _round_up(n, m):
    return ((n + m - 1) // m) * m


def _device_kind():
    try:
        return jax.devices()[0].device_kind.lower()
    except Exception:
        return ""


def _num_tensorcores(kind):
    # v7x exposes 2 TensorCores per device; "parallel" grid axes shard across them.
    return 2 if "v7" in kind else 1


def _default_elementwise_dtype(kind):
    # v6e / v7x have bf16 VALU + EUP; v5e and older do not -> keep elementwise in f32 there.
    return jnp.bfloat16 if ("v6" in kind or "v7" in kind) else jnp.float32


def _choose_tile_b(B, num_tc, max_tile=MAX_TILE_B):
    """Pick a batch-tile size.

    * Large tiles (up to `max_tile`) amortize the ~0.35 us per-grid-step overhead.
    * On 2-TC chips (v7x), guarantee an even number (>=2) of grid steps so both
      TensorCores get work and there is no tail-imbalance step.
    """
    if B <= 8:
        return 8
    if num_tc >= 2:
        pairs = -(-B // (2 * max_tile))            # ceil(B / (2*max_tile))
        steps = 2 * max(pairs, 1)                  # even step count >= 2
        return _round_up(-(-B // steps), 8)
    if B <= max_tile:
        return _round_up(B, 8)
    return max_tile


def critic_kernel(x_ref, vec_ref, w_ref, o_ref, *, ew_dtype):
    """One batch tile through the full network.

    x_ref   : (tile_b, input_dim)          f32
    vec_ref : (input_dim + 14, hidden)     f32   [W1 rows | (b,g,beta) x4 | w_out row | b_out row]
    w_ref   : (3, hidden, hidden)          bf16/f32 (matmul weights for layers 2..4)
    o_ref   : (tile_b, 1)                  f32
    """
    tb, input_dim = x_ref.shape
    n_mm = w_ref.shape[0]          # 3 hidden->hidden matmuls
    n_blocks = n_mm + 1            # 4 Linear+LN+LeakyReLU blocks
    mm_dtype = w_ref.dtype

    x = x_ref[...].astype(jnp.float32)
    vec = vec_ref[...]

    def ln_lrelu(h, j):
        # h: (tb, hidden) f32.  LN statistics in f32; normalize/affine/LeakyReLU in ew_dtype.
        base = input_dim + 3 * j
        g = vec[base + 1:base + 2, :].astype(ew_dtype)
        be = vec[base + 2:base + 3, :].astype(ew_dtype)
        mu = jnp.mean(h, axis=-1, keepdims=True)
        msq = jnp.mean(h * h, axis=-1, keepdims=True)
        var = jnp.maximum(msq - mu * mu, 0.0)          # one-pass variance, f32, clamped
        inv = jax.lax.rsqrt(var + LN_EPS)
        hn = ((h - mu) * inv).astype(ew_dtype)
        hn = hn * g + be
        return jnp.maximum(hn, LEAK * hn)              # LeakyReLU(0.2) as mul+max

    # --- block 0: Linear(input_dim -> hidden) as VPU broadcast FMAs (tiny K, skip the MXU).
    h = vec[input_dim:input_dim + 1, :]                    # bias b1, (1, hidden)
    for k in range(input_dim):                             # static unroll (input_dim = 2)
        h = h + x[:, k:k + 1] * vec[k:k + 1, :]            # (tb,1) * (1,hidden) -> (tb,hidden)
    h = ln_lrelu(h, 0)

    # --- blocks 1..3: hidden x hidden matmuls on the MXU (bf16 operands, f32 accumulation).
    for j in range(n_mm):
        base = input_dim + 3 * (j + 1)
        b = vec[base:base + 1, :]
        h = jnp.dot(h.astype(mm_dtype), w_ref[j],
                    preferred_element_type=jnp.float32) + b
        h = ln_lrelu(h, j + 1)

    # --- output head: Linear(hidden -> 1) as VPU mul + XLU lane reduce (degenerate N, skip MXU).
    w_out = vec[input_dim + 3 * n_blocks:input_dim + 3 * n_blocks + 1, :]        # (1, hidden)
    b_out = vec[input_dim + 3 * n_blocks + 1:input_dim + 3 * n_blocks + 2, :1]   # (1, 1)
    out = jnp.sum(h.astype(jnp.float32) * w_out, axis=-1, keepdims=True) + b_out
    o_ref[...] = out.astype(o_ref.dtype)


def pack_params(params, matmul_dtype):
    """Pack all small params into one (input_dim+14, hidden) f32 array and the three
    hidden x hidden weights into one (3, hidden, hidden) array of `matmul_dtype`."""
    w1 = params["hidden_layers"][0][0]                     # (input_dim, hidden)
    hidden = w1.shape[1]
    rows = [w1.astype(jnp.float32)]
    for (_, b, g, be) in params["hidden_layers"]:
        rows += [b.reshape(1, hidden).astype(jnp.float32),
                 g.reshape(1, hidden).astype(jnp.float32),
                 be.reshape(1, hidden).astype(jnp.float32)]
    rows.append(params["w_out"].reshape(1, hidden).astype(jnp.float32))          # w_out row
    rows.append(jnp.broadcast_to(params["b_out"].reshape(1, 1).astype(jnp.float32),
                                 (1, hidden)))                                    # b_out row
    vec_pack = jnp.concatenate(rows, axis=0)

    w_pack = jnp.stack([w for (w, _, _, _) in params["hidden_layers"][1:]],
                       axis=0).astype(matmul_dtype)
    return vec_pack, w_pack


def critic_forward(x, params, *, tile_b=None, matmul_dtype=jnp.bfloat16,
                   elementwise_dtype=None):
    B, input_dim = x.shape
    kind = _device_kind()

    if elementwise_dtype is None:
        elementwise_dtype = _default_elementwise_dtype(kind)
    if tile_b is None:
        tile_b = _choose_tile_b(B, _num_tensorcores(kind))
    tile_b = _round_up(tile_b, 8)

    # Pad the batch so any B is accepted (padded rows are zeros; dropped after the call).
    B_pad = _round_up(B, tile_b)
    if B_pad != B:
        x = jnp.pad(x, ((0, B_pad - B), (0, 0)))

    vec_pack, w_pack = pack_params(params, matmul_dtype)

    grid = (B_pad // tile_b,)
    in_specs = [
        pl.BlockSpec((tile_b, input_dim), lambda i: (i, 0)),
        pl.BlockSpec(vec_pack.shape, lambda i: (0, 0)),       # constant index -> stays resident
        pl.BlockSpec(w_pack.shape, lambda i: (0, 0, 0)),       # constant index -> stays resident
    ]
    out_specs = pl.BlockSpec((tile_b, 1), lambda i: (i, 0))

    kernel = functools.partial(critic_kernel, ew_dtype=elementwise_dtype)

    out = pl.pallas_call(
        kernel,
        out_shape=jax.ShapeDtypeStruct((B_pad, 1), jnp.float32),
        grid_spec=pltpu.PrefetchScalarGridSpec(
            num_scalar_prefetch=0,
            grid=grid,
            in_specs=in_specs,
            out_specs=out_specs,
        ),
        compiler_params=pltpu.CompilerParams(
            dimension_semantics=("parallel",)),  # shards batch tiles across TCs on v7x
    )(x, vec_pack, w_pack)

    return out[:B]


def init_params(key, input_dim=INPUT_DIM, hidden=HIDDEN):
    """Deterministic init mirroring the module's parameter shapes.
    Linear weights stored as [in, out]; LayerNorm gamma=1, beta=0 (PyTorch defaults)."""
    keys = jax.random.split(key, 10)
    dims = [(input_dim, hidden), (hidden, hidden), (hidden, hidden), (hidden, hidden)]
    hidden_layers = []
    for li, (din, dout) in enumerate(dims):
        bound = 1.0 / jnp.sqrt(din)
        w = jax.random.uniform(keys[2 * li], (din, dout), jnp.float32, -bound, bound)
        b = jax.random.uniform(keys[2 * li + 1], (1, dout), jnp.float32, -bound, bound)
        g = jnp.ones((1, dout), jnp.float32)
        be = jnp.zeros((1, dout), jnp.float32)
        hidden_layers.append((w, b, g, be))
    bound = 1.0 / jnp.sqrt(hidden)
    w_out = jax.random.uniform(keys[8], (hidden, 1), jnp.float32, -bound, bound)
    b_out = jax.random.uniform(keys[9], (1, 1), jnp.float32, -bound, bound)
    return {"hidden_layers": hidden_layers, "w_out": w_out, "b_out": b_out}


def critic_reference(x, params):
    """Pure-JAX f32 reference of the same forward pass."""
    h = x.astype(jnp.float32)
    for (w, b, g, be) in params["hidden_layers"]:
        h = h @ w + b
        mu = jnp.mean(h, axis=-1, keepdims=True)
        var = jnp.mean((h - mu) ** 2, axis=-1, keepdims=True)
        h = (h - mu) / jnp.sqrt(var + LN_EPS) * g + be
        h = jnp.where(h > 0, h, LEAK * h)
    return h @ params["w_out"] + params["b_out"]


if __name__ == "__main__":
    key = jax.random.PRNGKey(0)
    k_param, k_x = jax.random.split(key)
    params = init_params(k_param)

    B = 16
    x = jax.random.normal(k_x, (B, INPUT_DIM), jnp.float32)
    ref = critic_reference(x, params)

    # Exact path: f32 matmul + f32 elementwise -> tight tolerance.
    out_f32 = jax.block_until_ready(
        critic_forward(x, params, matmul_dtype=jnp.float32,
                       elementwise_dtype=jnp.float32))
    assert out_f32.shape == (B, 1)
    assert jnp.allclose(out_f32, ref, atol=1e-3, rtol=1e-3), (out_f32, ref)

    # Fast path (default): bf16 MXU operands, bf16 elementwise on v6e/v7x (f32 on v5e),
    # f32 LN statistics -> looser tolerance.
    out_fast = jax.block_until_ready(critic_forward(x, params))
    assert out_fast.shape == (B, 1)
    assert jnp.allclose(out_fast, ref, atol=5e-2, rtol=5e-2), (out_fast, ref)

    # Non-multiple batch exercising padding + multiple parallel grid steps.
    B2 = 300
    x2 = jax.random.normal(jax.random.PRNGKey(1), (B2, INPUT_DIM), jnp.float32)
    out2 = jax.block_until_ready(critic_forward(x2, params, tile_b=128))
    assert out2.shape == (B2, 1)
    assert jnp.allclose(out2, critic_reference(x2, params), atol=5e-2, rtol=5e-2)

    print("KERNEL_OK")
</pallas_src>

<mosaic_0001>
module attributes {stable_mosaic.version = 11 : i64} {
  func.func @critic_kernel(%arg0: i32, %arg1: memref<16x2xf32, #tpu.memory_space<vmem>>, %arg2: memref<16x128xf32, #tpu.memory_space<vmem>>, %arg3: memref<3x128x128xf32, #tpu.memory_space<vmem>>, %arg4: memref<16x1xf32, #tpu.memory_space<vmem>>) attributes {dimension_semantics = [#tpu.dimension_semantics<parallel>], iteration_bounds = array<i64: 1>, scalar_prefetch = 0 : i64, scratch_operands = 0 : i64, tpu.core_type = #tpu.core_type<tc>, window_params = [{transform_indices = @transform_0, window_bounds = array<i64: 16, 2>}, {pipeline_mode = #tpu.pipeline_mode<synchronous>, transform_indices = @transform_1, window_bounds = array<i64: 16, 128>}, {pipeline_mode = #tpu.pipeline_mode<synchronous>, transform_indices = @transform_2, window_bounds = array<i64: 3, 128, 128>}, {transform_indices = @transform_3, window_bounds = array<i64: 16, 1>}]} {
    %c0 = arith.constant 0 : index
    %c0_0 = arith.constant 0 : index
    %0 = vector.load %arg1[%c0, %c0_0] : memref<16x2xf32, #tpu.memory_space<vmem>>, vector<16x2xf32>
    %c0_1 = arith.constant 0 : index
    %c0_2 = arith.constant 0 : index
    %1 = vector.load %arg2[%c0_1, %c0_2] : memref<16x128xf32, #tpu.memory_space<vmem>>, vector<16x128xf32>
    %2 = vector.extract_strided_slice %1 {offsets = [2, 0], sizes = [1, 128], strides = [1, 1]} : vector<16x128xf32> to vector<1x128xf32>
    %3 = vector.extract_strided_slice %0 {offsets = [0, 0], sizes = [16, 1], strides = [1, 1]} : vector<16x2xf32> to vector<16x1xf32>
    %4 = vector.extract_strided_slice %1 {offsets = [0, 0], sizes = [1, 128], strides = [1, 1]} : vector<16x128xf32> to vector<1x128xf32>
    %5 = vector.broadcast %3 : vector<16x1xf32> to vector<16x128xf32>
    %6 = vector.broadcast %4 : vector<1x128xf32> to vector<16x128xf32>
    %7 = arith.mulf %5, %6 : vector<16x128xf32>
    %8 = vector.broadcast %2 : vector<1x128xf32> to vector<16x128xf32>
    %9 = arith.addf %8, %7 : vector<16x128xf32>
    %10 = vector.extract_strided_slice %0 {offsets = [0, 1], sizes = [16, 1], strides = [1, 1]} : vector<16x2xf32> to vector<16x1xf32>
    %11 = vector.extract_strided_slice %1 {offsets = [1, 0], sizes = [1, 128], strides = [1, 1]} : vector<16x128xf32> to vector<1x128xf32>
    %12 = vector.broadcast %10 : vector<16x1xf32> to vector<16x128xf32>
    %13 = vector.broadcast %11 : vector<1x128xf32> to vector<16x128xf32>
    %14 = arith.mulf %12, %13 : vector<16x128xf32>
    %15 = arith.addf %9, %14 : vector<16x128xf32>
    %16 = vector.extract_strided_slice %1 {offsets = [3, 0], sizes = [1, 128], strides = [1, 1]} : vector<16x128xf32> to vector<1x128xf32>
    %17 = vector.extract_strided_slice %1 {offsets = [4, 0], sizes = [1, 128], strides = [1, 1]} : vector<16x128xf32> to vector<1x128xf32>
    %cst = arith.constant dense<0.000000e+00> : vector<16xf32>
    %18 = vector.multi_reduction <add>, %15, %cst [1] : vector<16x128xf32> to vector<16xf32>
    %19 = vector.shape_cast %18 : vector<16xf32> to vector<16x1xf32>
    %cst_3 = arith.constant 1.280000e+02 : f32
    %20 = vector.broadcast %cst_3 : f32 to vector<16x1xf32>
    %21 = arith.divf %19, %20 : vector<16x1xf32>
    %22 = arith.mulf %15, %15 : vector<16x128xf32>
    %cst_4 = arith.constant dense<0.000000e+00> : vector<16xf32>
    %23 = vector.multi_reduction <add>, %22, %cst_4 [1] : vector<16x128xf32> to vector<16xf32>
    %24 = vector.shape_cast %23 : vector<16xf32> to vector<16x1xf32>
    %cst_5 = arith.constant 1.280000e+02 : f32
    %25 = vector.broadcast %cst_5 : f32 to vector<16x1xf32>
    %26 = arith.divf %24, %25 : vector<16x1xf32>
    %27 = arith.mulf %21, %21 : vector<16x1xf32>
    %28 = arith.subf %26, %27 : vector<16x1xf32>
    %cst_6 = arith.constant 0.000000e+00 : f32
    %29 = vector.broadcast %cst_6 : f32 to vector<16x1xf32>
    %30 = arith.maximumf %28, %29 : vector<16x1xf32>
    %cst_7 = arith.constant 9.99999974E-6 : f32
    %31 = vector.broadcast %cst_7 : f32 to vector<16x1xf32>
    %32 = arith.addf %30, %31 : vector<16x1xf32>
    %33 = math.rsqrt %32 : vector<16x1xf32>
    %34 = vector.broadcast %21 : vector<16x1xf32> to vector<16x128xf32>
    %35 = arith.subf %15, %34 : vector<16x128xf32>
    %36 = vector.broadcast %33 : vector<16x1xf32> to vector<16x128xf32>
    %37 = arith.mulf %35, %36 : vector<16x128xf32>
    %38 = vector.broadcast %16 : vector<1x128xf32> to vector<16x128xf32>
    %39 = arith.mulf %37, %38 : vector<16x128xf32>
    %40 = vector.broadcast %17 : vector<1x128xf32> to vector<16x128xf32>
    %41 = arith.addf %39, %40 : vector<16x128xf32>
    %cst_8 = arith.constant 2.000000e-01 : f32
    %42 = vector.broadcast %cst_8 : f32 to vector<16x128xf32>
    %43 = arith.mulf %42, %41 : vector<16x128xf32>
    %44 = arith.maximumf %41, %43 : vector<16x128xf32>
    %45 = vector.extract_strided_slice %1 {offsets = [5, 0], sizes = [1, 128], strides = [1, 1]} : vector<16x128xf32> to vector<1x128xf32>
    %c0_9 = arith.constant 0 : index
    %c0_10 = arith.constant 0 : index
    %c0_11 = arith.constant 0 : index
    %46 = vector.load %arg3[%c0_9, %c0_10, %c0_11] : memref<3x128x128xf32, #tpu.memory_space<vmem>>, vector<1x128x128xf32>
    %47 = vector.shape_cast %46 : vector<1x128x128xf32> to vector<128x128xf32>
    %cst_12 = arith.constant dense<0.000000e+00> : vector<16x128xf32>
    %48 = tpu.matmul %44, %47, %cst_12 {dimension_numbers = #tpu.dot_dimension_numbers<[1], [0], [0], [1], [0, 0, 1, 1], [], []>} : vector<16x128xf32>, vector<128x128xf32>, vector<16x128xf32> -> vector<16x128xf32>
    %49 = vector.broadcast %45 : vector<1x128xf32> to vector<16x128xf32>
    %50 = arith.addf %48, %49 : vector<16x128xf32>
    %51 = vector.extract_strided_slice %1 {offsets = [6, 0], sizes = [1, 128], strides = [1, 1]} : vector<16x128xf32> to vector<1x128xf32>
    %52 = vector.extract_strided_slice %1 {offsets = [7, 0], sizes = [1, 128], strides = [1, 1]} : vector<16x128xf32> to vector<1x128xf32>
    %cst_13 = arith.constant dense<0.000000e+00> : vector<16xf32>
    %53 = vector.multi_reduction <add>, %50, %cst_13 [1] : vector<16x128xf32> to vector<16xf32>
    %54 = vector.shape_cast %53 : vector<16xf32> to vector<16x1xf32>
    %cst_14 = arith.constant 1.280000e+02 : f32
    %55 = vector.broadcast %cst_14 : f32 to vector<16x1xf32>
    %56 = arith.divf %54, %55 : vector<16x1xf32>
    %57 = arith.mulf %50, %50 : vector<16x128xf32>
    %cst_15 = arith.constant dense<0.000000e+00> : vector<16xf32>
    %58 = vector.multi_reduction <add>, %57, %cst_15 [1] : vector<16x128xf32> to vector<16xf32>
    %59 = vector.shape_cast %58 : vector<16xf32> to vector<16x1xf32>
    %cst_16 = arith.constant 1.280000e+02 : f32
    %60 = vector.broadcast %cst_16 : f32 to vector<16x1xf32>
    %61 = arith.divf %59, %60 : vector<16x1xf32>
    %62 = arith.mulf %56, %56 : vector<16x1xf32>
    %63 = arith.subf %61, %62 : vector<16x1xf32>
    %cst_17 = arith.constant 0.000000e+00 : f32
    %64 = vector.broadcast %cst_17 : f32 to vector<16x1xf32>
    %65 = arith.maximumf %63, %64 : vector<16x1xf32>
    %cst_18 = arith.constant 9.99999974E-6 : f32
    %66 = vector.broadcast %cst_18 : f32 to vector<16x1xf32>
    %67 = arith.addf %65, %66 : vector<16x1xf32>
    %68 = math.rsqrt %67 : vector<16x1xf32>
    %69 = vector.broadcast %56 : vector<16x1xf32> to vector<16x128xf32>
    %70 = arith.subf %50, %69 : vector<16x128xf32>
    %71 = vector.broadcast %68 : vector<16x1xf32> to vector<16x128xf32>
    %72 = arith.mulf %70, %71 : vector<16x128xf32>
    %73 = vector.broadcast %51 : vector<1x128xf32> to vector<16x128xf32>
    %74 = arith.mulf %72, %73 : vector<16x128xf32>
    %75 = vector.broadcast %52 : vector<1x128xf32> to vector<16x128xf32>
    %76 = arith.addf %74, %75 : vector<16x128xf32>
    %cst_19 = arith.constant 2.000000e-01 : f32
    %77 = vector.broadcast %cst_19 : f32 to vector<16x128xf32>
    %78 = arith.mulf %77, %76 : vector<16x128xf32>
    %79 = arith.maximumf %76, %78 : vector<16x128xf32>
    %80 = vector.extract_strided_slice %1 {offsets = [8, 0], sizes = [1, 128], strides = [1, 1]} : vector<16x128xf32> to vector<1x128xf32>
    %c1 = arith.constant 1 : index
    %c0_20 = arith.constant 0 : index
    %c0_21 = arith.constant 0 : index
    %81 = vector.load %arg3[%c1, %c0_20, %c0_21] : memref<3x128x128xf32, #tpu.memory_space<vmem>>, vector<1x128x128xf32>
    %82 = vector.shape_cast %81 : vector<1x128x128xf32> to vector<128x128xf32>
    %cst_22 = arith.constant dense<0.000000e+00> : vector<16x128xf32>
    %83 = tpu.matmul %79, %82, %cst_22 {dimension_numbers = #tpu.dot_dimension_numbers<[1], [0], [0], [1], [0, 0, 1, 1], [], []>} : vector<16x128xf32>, vector<128x128xf32>, vector<16x128xf32> -> vector<16x128xf32>
    %84 = vector.broadcast %80 : vector<1x128xf32> to vector<16x128xf32>
    %85 = arith.addf %83, %84 : vector<16x128xf32>
    %86 = vector.extract_strided_slice %1 {offsets = [9, 0], sizes = [1, 128], strides = [1, 1]} : vector<16x128xf32> to vector<1x128xf32>
    %87 = vector.extract_strided_slice %1 {offsets = [10, 0], sizes = [1, 128], strides = [1, 1]} : vector<16x128xf32> to vector<1x128xf32>
    %cst_23 = arith.constant dense<0.000000e+00> : vector<16xf32>
    %88 = vector.multi_reduction <add>, %85, %cst_23 [1] : vector<16x128xf32> to vector<16xf32>
    %89 = vector.shape_cast %88 : vector<16xf32> to vector<16x1xf32>
    %cst_24 = arith.constant 1.280000e+02 : f32
    %90 = vector.broadcast %cst_24 : f32 to vector<16x1xf32>
    %91 = arith.divf %89, %90 : vector<16x1xf32>
    %92 = arith.mulf %85, %85 : vector<16x128xf32>
    %cst_25 = arith.constant dense<0.000000e+00> : vector<16xf32>
    %93 = vector.multi_reduction <add>, %92, %cst_25 [1] : vector<16x128xf32> to vector<16xf32>
    %94 = vector.shape_cast %93 : vector<16xf32> to vector<16x1xf32>
    %cst_26 = arith.constant 1.280000e+02 : f32
    %95 = vector.broadcast %cst_26 : f32 to vector<16x1xf32>
    %96 = arith.divf %94, %95 : vector<16x1xf32>
    %97 = arith.mulf %91, %91 : vector<16x1xf32>
    %98 = arith.subf %96, %97 : vector<16x1xf32>
    %cst_27 = arith.constant 0.000000e+00 : f32
    %99 = vector.broadcast %cst_27 : f32 to vector<16x1xf32>
    %100 = arith.maximumf %98, %99 : vector<16x1xf32>
    %cst_28 = arith.constant 9.99999974E-6 : f32
    %101 = vector.broadcast %cst_28 : f32 to vector<16x1xf32>
    %102 = arith.addf %100, %101 : vector<16x1xf32>
    %103 = math.rsqrt %102 : vector<16x1xf32>
    %104 = vector.broadcast %91 : vector<16x1xf32> to vector<16x128xf32>
    %105 = arith.subf %85, %104 : vector<16x128xf32>
    %106 = vector.broadcast %103 : vector<16x1xf32> to vector<16x128xf32>
    %107 = arith.mulf %105, %106 : vector<16x128xf32>
    %108 = vector.broadcast %86 : vector<1x128xf32> to vector<16x128xf32>
    %109 = arith.mulf %107, %108 : vector<16x128xf32>
    %110 = vector.broadcast %87 : vector<1x128xf32> to vector<16x128xf32>
    %111 = arith.addf %109, %110 : vector<16x128xf32>
    %cst_29 = arith.constant 2.000000e-01 : f32
    %112 = vector.broadcast %cst_29 : f32 to vector<16x128xf32>
    %113 = arith.mulf %112, %111 : vector<16x128xf32>
    %114 = arith.maximumf %111, %113 : vector<16x128xf32>
    %115 = vector.extract_strided_slice %1 {offsets = [11, 0], sizes = [1, 128], strides = [1, 1]} : vector<16x128xf32> to vector<1x128xf32>
    %c2 = arith.constant 2 : index
    %c0_30 = arith.constant 0 : index
    %c0_31 = arith.constant 0 : index
    %116 = vector.load %arg3[%c2, %c0_30, %c0_31] : memref<3x128x128xf32, #tpu.memory_space<vmem>>, vector<1x128x128xf32>
    %117 = vector.shape_cast %116 : vector<1x128x128xf32> to vector<128x128xf32>
    %cst_32 = arith.constant dense<0.000000e+00> : vector<16x128xf32>
    %118 = tpu.matmul %114, %117, %cst_32 {dimension_numbers = #tpu.dot_dimension_numbers<[1], [0], [0], [1], [0, 0, 1, 1], [], []>} : vector<16x128xf32>, vector<128x128xf32>, vector<16x128xf32> -> vector<16x128xf32>
    %119 = vector.broadcast %115 : vector<1x128xf32> to vector<16x128xf32>
    %120 = arith.addf %118, %119 : vector<16x128xf32>
    %121 = vector.extract_strided_slice %1 {offsets = [12, 0], sizes = [1, 128], strides = [1, 1]} : vector<16x128xf32> to vector<1x128xf32>
    %122 = vector.extract_strided_slice %1 {offsets = [13, 0], sizes = [1, 128], strides = [1, 1]} : vector<16x128xf32> to vector<1x128xf32>
    %cst_33 = arith.constant dense<0.000000e+00> : vector<16xf32>
    %123 = vector.multi_reduction <add>, %120, %cst_33 [1] : vector<16x128xf32> to vector<16xf32>
    %124 = vector.shape_cast %123 : vector<16xf32> to vector<16x1xf32>
    %cst_34 = arith.constant 1.280000e+02 : f32
    %125 = vector.broadcast %cst_34 : f32 to vector<16x1xf32>
    %126 = arith.divf %124, %125 : vector<16x1xf32>
    %127 = arith.mulf %120, %120 : vector<16x128xf32>
    %cst_35 = arith.constant dense<0.000000e+00> : vector<16xf32>
    %128 = vector.multi_reduction <add>, %127, %cst_35 [1] : vector<16x128xf32> to vector<16xf32>
    %129 = vector.shape_cast %128 : vector<16xf32> to vector<16x1xf32>
    %cst_36 = arith.constant 1.280000e+02 : f32
    %130 = vector.broadcast %cst_36 : f32 to vector<16x1xf32>
    %131 = arith.divf %129, %130 : vector<16x1xf32>
    %132 = arith.mulf %126, %126 : vector<16x1xf32>
    %133 = arith.subf %131, %132 : vector<16x1xf32>
    %cst_37 = arith.constant 0.000000e+00 : f32
    %134 = vector.broadcast %cst_37 : f32 to vector<16x1xf32>
    %135 = arith.maximumf %133, %134 : vector<16x1xf32>
    %cst_38 = arith.constant 9.99999974E-6 : f32
    %136 = vector.broadcast %cst_38 : f32 to vector<16x1xf32>
    %137 = arith.addf %135, %136 : vector<16x1xf32>
    %138 = math.rsqrt %137 : vector<16x1xf32>
    %139 = vector.broadcast %126 : vector<16x1xf32> to vector<16x128xf32>
    %140 = arith.subf %120, %139 : vector<16x128xf32>
    %141 = vector.broadcast %138 : vector<16x1xf32> to vector<16x128xf32>
    %142 = arith.mulf %140, %141 : vector<16x128xf32>
    %143 = vector.broadcast %121 : vector<1x128xf32> to vector<16x128xf32>
    %144 = arith.mulf %142, %143 : vector<16x128xf32>
    %145 = vector.broadcast %122 : vector<1x128xf32> to vector<16x128xf32>
    %146 = arith.addf %144, %145 : vector<16x128xf32>
    %cst_39 = arith.constant 2.000000e-01 : f32
    %147 = vector.broadcast %cst_39 : f32 to vector<16x128xf32>
    %148 = arith.mulf %147, %146 : vector<16x128xf32>
    %149 = arith.maximumf %146, %148 : vector<16x128xf32>
    %150 = vector.extract_strided_slice %1 {offsets = [14, 0], sizes = [1, 128], strides = [1, 1]} : vector<16x128xf32> to vector<1x128xf32>
    %151 = vector.extract_strided_slice %1 {offsets = [15, 0], sizes = [1, 1], strides = [1, 1]} : vector<16x128xf32> to vector<1x1xf32>
    %152 = vector.broadcast %150 : vector<1x128xf32> to vector<16x128xf32>
    %153 = arith.mulf %149, %152 : vector<16x128xf32>
    %cst_40 = arith.constant dense<0.000000e+00> : vector<16xf32>
    %154 = vector.multi_reduction <add>, %153, %cst_40 [1] : vector<16x128xf32> to vector<16xf32>
    %155 = vector.shape_cast %154 : vector<16xf32> to vector<16x1xf32>
    %156 = vector.broadcast %151 : vector<1x1xf32> to vector<16x1xf32>
    %157 = arith.addf %155, %156 : vector<16x1xf32>
    %c0_41 = arith.constant 0 : index
    %c0_42 = arith.constant 0 : index
    %158 = vector.load %arg4[%c0_41, %c0_42] : memref<16x1xf32, #tpu.memory_space<vmem>>, vector<16x1xf32>
    tpu.vector_store %arg4[%c0_41, %c0_42], %157 {strides = array<i32>} : memref<16x1xf32, #tpu.memory_space<vmem>>, vector<16x1xf32>,
    return
  }
  func.func @transform_0(%arg0: i32) -> (i32, i32) {
    %c0_i32 = arith.constant 0 : i32
    %c0_i32_0 = arith.constant 0 : i32
    return %arg0, %c0_i32 : i32, i32
  }
  func.func @transform_1(%arg0: i32) -> (i32, i32) {
    %c0_i32 = arith.constant 0 : i32
    %c0_i32_0 = arith.constant 0 : i32
    %c0_i32_1 = arith.constant 0 : i32
    return %c0_i32, %c0_i32_0 : i32, i32
  }
  func.func @transform_2(%arg0: i32) -> (i32, i32, i32) {
    %c0_i32 = arith.constant 0 : i32
    %c0_i32_0 = arith.constant 0 : i32
    %c0_i32_1 = arith.constant 0 : i32
    %c0_i32_2 = arith.constant 0 : i32
    return %c0_i32, %c0_i32_0, %c0_i32_1 : i32, i32, i32
  }
  func.func @transform_3(%arg0: i32) -> (i32, i32) {
    %c0_i32 = arith.constant 0 : i32
    %c0_i32_0 = arith.constant 0 : i32
    return %arg0, %c0_i32 : i32, i32
  }
}

</mosaic_0001>

<bundles_post_ra>
// kernel: tpu_custom_call.1
= control target key start
LH: loop header
LB: loop body
LE: loop exit
PB: predicated region body
PF: predicated region fallthrough
CT: control target
= control target key end

     0   :  { %8 = vsyncpa [#allocation3], 0  ;;  %s861_s12 = smov [#allocation2]   ;;  %s1014_s0 = inlined_call_operand.vmem [shape: f32[16,2], index: 0, kind: input, shape index: {}]   ;;  %s1015_s1 = inlined_call_operand.vmem [shape: f32[16,128], index: 1, kind: input, shape index: {}]   ;;  %s1016_s2 = inlined_call_operand.hbm [shape: f32[3,128,128], index: 2, kind: input, shape index: {}]   ;;  %s1017_s3 = inlined_call_operand.vmem [shape: f32[16,1], index: 3, kind: output, shape index: {}]  }
   0x1   :  { %s18_s13 = sshll.u32 %s861_s12, 4  ;;  %s837_s16 = scalar_lea.hbm %s1016_s2, 6144  ;;  %s19_s13 = int_to_ptr.vmem [resolvable:$true] %s18_s13 }
   0x2   :  { %p838_p0 = scmp.ne.s32.totalorder %s1016_s2, %s837_s16  ;;  %p841_p1 = scmp.lt.u32.totalorder %s837_s16, %s1016_s2 }
   0x4   :  { %p843_p2 = pnand %p841_p1, %p838_p0 }
   0x6   :  { %846 = shalt.err (!%p843_p2)
}
   0x7   :  { %s847_s21 = scalar_lea.vmem %s19_s13, 6144  ;;  %p852_p4 = scmp.lt.s32.totalorder %s19_s13, %s19_s13 }
   0x8   :  { %p848_p3 = scmp.ne.s32.totalorder %s19_s13, %s847_s21  ;;  %p853_p5 = scmp.lt.s32.totalorder %s847_s21, %s847_s21 }
   0xa   :  { %p854_p6 = por %p853_p5, %p852_p4 }
   0xc   :  { %p855_p7 = pnand %p854_p6, %p848_p3 }
   0xe   :  { %858 = shalt.err (!%p855_p7)
}
   0xf   :  { %s862_s22 = smov 128   ;;  %s863_s23 = smov 8  }
  0x10   :  { %24 = dma.hbm_to_vmem [thread:$0]  %s1016_s2, 6144, %s19_s13, [#allocation3], %s862_s22, %s862_s22, %s863_s23  }
  0x11   :  { %859 = dma.done.wait [#allocation3], 6144  }
  0x12   :  { %860 = vsyncadd [#allocation3], 4294961152  ;;  %v864_v0 = vmov 1   ;;  %v865_v1 = vmov 0   ;;  %v28_v2 = vld [vmem:[%s1014_s0] sm:$0xff]  ;;  %v29_v3 = vld [vmem:[%s1014_s0 + $0x8] sm:$0xff]  ;;  %v42_v4 = vlaneseq }
  0x13   :  { %819 = vset.pattern.permute.xlu1 %v864_v0  ;;  %818 = vset.pattern.permute.xlu0 %v865_v1  ;;  %v911_v8 = vld [vmem:[%s1015_s1] sm:$0xff]  ;;  %v116_v28 = vld [vmem:[#allocation2 + $0x8] sm:$0xff]  ;;  %v117_v30 = vld [vmem:[#allocation2 + $0x10] sm:$0xff]  ;;  %vm550_vm0 = vcmask 7168  }
  0x14   :  { %55 = vperm.xlu1 %819, %v28_v2   ;;  %34 = vperm.xlu0 %818, %v28_v2   ;;  %v904_v5 = vshrl.u32 %v42_v4, 7  ;;  %v115_v27 = vld [vmem:[#allocation2] sm:$0xff]  ;;  %v118_v31 = vld [vmem:[#allocation2 + $0x18] sm:$0xff]  ;;  %v120_v34 = vld [vmem:[#allocation2 + $0x28] sm:$0xff] }
  0x15   :  { %v717_v29 = vpack.c.bf16 %v116_v28, %v115_v27  ;;  %v721_v32 = vpack.c.bf16 %v118_v31, %v117_v30  ;;  %v119_v33 = vld [vmem:[#allocation2 + $0x20] sm:$0xff]  ;;  %v121_v36 = vld [vmem:[#allocation2 + $0x30] sm:$0xff]  ;;  %v122_v37 = vld [vmem:[#allocation2 + $0x38] sm:$0xff] }
  0x16   :  { %v64_v6 = vsub.s32 1, %v904_v5  ;;  %v44_v7 = vsub.s32 0, %v904_v5  ;;  %v50_v9 = vsub.s32 2, %v904_v5  ;;  %v725_v35 = vpack.c.bf16 %v120_v34, %v119_v33  ;;  %v123_v39 = vld [vmem:[#allocation2 + $0x40] sm:$0xff]  ;;  %v124_v40 = vld [vmem:[#allocation2 + $0x48] sm:$0xff]  ;;  %v125_v41 = vld [vmem:[#allocation2 + $0x50] sm:$0xff] }
  0x17   :  { %718 = vmatprep.subr.bf16.mxu0 %v717_v29  ;;  %v729_v38 = vpack.c.bf16 %v122_v37, %v121_v36  ;;  %v733_v42 = vpack.c.bf16 %v124_v40, %v123_v39  ;;  %v126_v43 = vld [vmem:[#allocation2 + $0x58] sm:$0xff]  ;;  %v127_v45 = vld [vmem:[#allocation2 + $0x60] sm:$0xff]  ;;  %v128_v46 = vld [vmem:[#allocation2 + $0x68] sm:$0xff]  ;;  %v107_v4 = vsub.s32 4, %v904_v5  ;;  %v133_v27 = vsub.s32 5, %v904_v5 }
  0x18   :  { %59 = vperm.xlu1 %819, %v29_v3   ;;  %39 = vperm.xlu0 %818, %v29_v3   ;;  %v65_v10 = vrot.slane %v911_v8, %v64_v6  ;;  %v45_v11 = vrot.slane %v911_v8, %v44_v7  ;;  %v51_v12 = vrot.slane %v911_v8, %v50_v9  ;;  %v129_v48 = vld [vmem:[#allocation2 + $0x70] sm:$0xff]  ;;  %v130_v49 = vld [vmem:[#allocation2 + $0x78] sm:$0xff]  ;;  %v101_v3 = vsub.s32 3, %v904_v5  ;;  %v255_v34 = vld [vmem:[#allocation2 + $0x80] sm:$0xff] }
  0x19   :  { %720 = vmatpush3.bf16.msra.mxu0 %v717_v29  ;;  %v737_v44 = vpack.c.bf16 %v126_v43, %v125_v41  ;;  %v741_v47 = vpack.c.bf16 %v128_v46, %v127_v45  ;;  %v745_v50 = vpack.c.bf16 %v130_v49, %v129_v48  ;;  %v134_v28 = vrot.slane %v911_v8, %v133_v27  ;;  %v257_v37 = vld [vmem:[#allocation2 + $0x90] sm:$0xff]  ;;  %v259_v40 = vld [vmem:[#allocation2 + $0xa0] sm:$0xff]  ;;  %v260_v41 = vld [vmem:[#allocation2 + $0xa8] sm:$0xff] }
  0x1a   :  { %722 = vmatprep.subr.bf16.mxu0 %v721_v32  ;;  %v261_v43 = vld [vmem:[#allocation2 + $0xb0] sm:$0xff]  ;;  %v263_v46 = vld [vmem:[#allocation2 + $0xc0] sm:$0xff] }
  0x1b   :  { %v265_v49 = vld [vmem:[#allocation2 + $0xd0] sm:$0xff] }
  0x1c   :  { %820 = vset.pattern.permute.xlu0 %v864_v0 }
  0x1d   :  { %724 = vmatpush3.bf16.msra.mxu0 %v721_v32 }
  0x1e   :  { %726 = vmatprep.subr.bf16.mxu0 %v725_v35 }
  0x21   :  { %728 = vmatpush3.bf16.msra.mxu0 %v725_v35  ;;  %v256_v35 = vld [vmem:[#allocation2 + $0x88] sm:$0xff] }
  0x22   :  { %730 = vmatprep.subr.bf16.mxu0 %v729_v38  ;;  %v749_v36 = vpack.c.bf16 %v256_v35, %v255_v34 }
  0x24   :  { %750 = vmatprep.subr.bf16.mxu1 %v749_v36 }
  0x25   :  { %732 = vmatpush3.bf16.msra.mxu0 %v729_v38  ;;  %752 = vmatpush3.bf16.msra.mxu1 %v749_v36  ;;  %v258_v38 = vld [vmem:[#allocation2 + $0x98] sm:$0xff] }
  0x26   :  { %734 = vmatprep.subr.bf16.mxu0 %v733_v42  ;;  %v753_v39 = vpack.c.bf16 %v258_v38, %v257_v37 }
  0x28   :  { %754 = vmatprep.subr.bf16.mxu1 %v753_v39 }
  0x29   :  { %736 = vmatpush3.bf16.msra.mxu0 %v733_v42  ;;  %756 = vmatpush3.bf16.msra.mxu1 %v753_v39  ;;  %v757_v42 = vpack.c.bf16 %v260_v41, %v259_v40 }
  0x2a   :  { %738 = vmatprep.subr.bf16.mxu0 %v737_v44 }
  0x2b   :  { %758 = vmatprep.subr.bf16.mxu1 %v757_v42 }
  0x2d   :  { %740 = vmatpush3.bf16.msra.mxu0 %v737_v44  ;;  %760 = vmatpush3.bf16.msra.mxu1 %v757_v42  ;;  %v262_v44 = vld [vmem:[#allocation2 + $0xb8] sm:$0xff] }
  0x2e   :  { %742 = vmatprep.subr.bf16.mxu0 %v741_v47  ;;  %v761_v45 = vpack.c.bf16 %v262_v44, %v261_v43  ;;  %v395_v43 = vld [vmem:[#allocation2 + $0x100] sm:$0xff] }
  0x30   :  { %762 = vmatprep.subr.bf16.mxu1 %v761_v45 }
  0x31   :  { %744 = vmatpush3.bf16.msra.mxu0 %v741_v47  ;;  %v264_v47 = vld [vmem:[#allocation2 + $0xc8] sm:$0xff]  ;;  %764 = vmatpush3.bf16.msra.mxu1 %v761_v45  ;;  %v397_v45 = vld [vmem:[#allocation2 + $0x110] sm:$0xff] }
  0x32   :  { %746 = vmatprep.subr.bf16.mxu0 %v745_v50  ;;  %v765_v48 = vpack.c.bf16 %v264_v47, %v263_v46  ;;  %v398_v46 = vld [vmem:[#allocation2 + $0x118] sm:$0xff] }
  0x33   :  { %v785_v47 = vpack.c.bf16 %v398_v46, %v397_v45 }
  0x34   :  { %766 = vmatprep.subr.bf16.mxu1 %v765_v48 }
  0x35   :  { %748 = vmatpush3.bf16.msra.mxu0 %v745_v50  ;;  %v266_v50 = vld [vmem:[#allocation2 + $0xd8] sm:$0xff]  ;;  %768 = vmatpush3.bf16.msra.mxu1 %v765_v48  ;;  %v399_v48 = vld [vmem:[#allocation2 + $0x120] sm:$0xff] }
  0x93   :  { %v56_v13 = vpop.permute.xlu1 %55  ;;  %v35_v14 = vpop.permute.xlu0 %34 }
  0x94   :  { %v66_v15 = vmul.f32 %v65_v10, %v56_v13  ;;  %v46_v16 = vmul.f32 %v45_v11, %v35_v14  ;;  %v108_v14 = vrot.slane %v911_v8, %v107_v4 }
  0x96   :  { %v52_v17 = vadd.f32 %v51_v12, %v46_v16 }
  0x97   :  { %v60_v18 = vpop.permute.xlu1 %59  ;;  %v40_v19 = vpop.permute.xlu0 %39 }
  0x98   :  { %v47_v20 = vmul.f32 %v45_v11, %v40_v19  ;;  %v923_v21 = vadd.f32 %v66_v15, %v52_v17  ;;  %v67_v22 = vmul.f32 %v65_v10, %v60_v18  ;;  %v102_v11 = vrot.slane %v911_v8, %v101_v3 }
  0x9a   :  { %v53_v23 = vadd.f32 %v51_v12, %v47_v20  ;;  %70 = vadd.xlane.f32.xlu0 %v923_v21  ;;  %v77_v24 = vmul.f32 %v923_v21, %v923_v21 }
  0x9c   :  { %v928_v25 = vadd.f32 %v67_v22, %v53_v23 }
  0x9e   :  { %79 = vadd.xlane.f32.xlu0 %v77_v24  ;;  %72 = vadd.xlane.f32.xlu1 %v928_v25  ;;  %v78_v26 = vmul.f32 %v928_v25, %v928_v25 }
  0xa2   :  { %81 = vadd.xlane.f32.xlu0 %v78_v26 }
 0x127   :  { %v71_v51 = vpop.xlane.xlu0 %70 }
 0x128   :  { %v75_v52 = vmul.f32 0.0078125, %v71_v51  ;;  %v769_v51 = vpack.c.bf16 %v266_v50, %v265_v49  ;;  %v400_v49 = vld [vmem:[#allocation2 + $0x128] sm:$0xff] }
 0x129   :  { %v789_v50 = vpack.c.bf16 %v400_v49, %v399_v48 }
 0x12a   :  { %v85_v55 = vmul.f32 %v75_v52, %v75_v52  ;;  %v95_v10 = vsub.f32 %v923_v21, %v75_v52  ;;  %v267_v52 = vld [vmem:[#allocation2 + $0xe0] sm:$0xff]  ;;  %770 = vmatprep.subr.bf16.mxu1 %v769_v51 }
 0x12b   :  { %v73_v53 = vpop.xlane.xlu1 %72  ;;  %v80_v54 = vpop.xlane.xlu0 %79  ;;  %772 = vmatpush3.bf16.msra.mxu1 %v769_v51  ;;  %v401_v51 = vld [vmem:[#allocation2 + $0x130] sm:$0xff] }
 0x12c   :  { %v76_v56 = vmul.f32 0.0078125, %v73_v53  ;;  %v83_v57 = vmul.f32 0.0078125, %v80_v54  ;;  %v268_v53 = vld [vmem:[#allocation2 + $0xe8] sm:$0xff] }
 0x12d   :  { %v773_v54 = vpack.c.bf16 %v268_v53, %v267_v52  ;;  %v402_v52 = vld [vmem:[#allocation2 + $0x138] sm:$0xff] }
 0x12e   :  { %v87_v58 = vsub.f32 %v83_v57, %v85_v55  ;;  %v86_v60 = vmul.f32 %v76_v56, %v76_v56  ;;  %v96_v15 = vsub.f32 %v928_v25, %v76_v56  ;;  %v269_v55 = vld [vmem:[#allocation2 + $0xf0] sm:$0xff]  ;;  %v270_v56 = vld [vmem:[#allocation2 + $0xf8] sm:$0xff]  ;;  %v793_v53 = vpack.c.bf16 %v402_v52, %v401_v51 }
 0x12f   :  { %v82_v59 = vpop.xlane.xlu0 %81  ;;  %774 = vmatprep.subr.bf16.mxu1 %v773_v54  ;;  %v777_v57 = vpack.c.bf16 %v270_v56, %v269_v55  ;;  %v404_v55 = vld [vmem:[#allocation2 + $0x148] sm:$0xff] }
 0x130   :  { %v89_v61 = vmax.f32 %v87_v58, 0.0  ;;  %v84_v62 = vmul.f32 0.0078125, %v82_v59  ;;  %776 = vmatpush3.bf16.msra.mxu1 %v773_v54  ;;  %v403_v54 = vld [vmem:[#allocation2 + $0x140] sm:$0xff] }
 0x131   :  { %778 = vmatprep.subr.bf16.mxu1 %v777_v57  ;;  %v797_v56 = vpack.c.bf16 %v404_v55, %v403_v54 }
 0x132   :  { %v91_v63 = vadd.f32 1e-05, %v89_v61  ;;  %v88_v0 = vsub.f32 %v84_v62, %v86_v60 }
 0x134   :  { %821 = vrsqrt.f32 %v91_v63  ;;  %v90_v1 = vmax.f32 %v88_v0, 0.0  ;;  %780 = vmatpush3.bf16.msra.mxu1 %v777_v57  ;;  %v405_v57 = vld [vmem:[#allocation2 + $0x150] sm:$0xff] }
 0x136   :  { %v92_v2 = vadd.f32 1e-05, %v90_v1 }
 0x138   :  { %823 = vrsqrt.f32 %v92_v2 }
 0x13e   :  { %v822_v12 = vpop.eup %821 }
 0x13f   :  { %v97_v13 = vmul.f32 %v822_v12, %v95_v10 }
 0x141   :  { %v103_v16 = vmul.f32 %v102_v11, %v97_v13 }
 0x142   :  { %v824_v17 = vpop.eup %823 }
 0x143   :  { %v109_v18 = vadd.f32 %v108_v14, %v103_v16  ;;  %v98_v19 = vmul.f32 %v824_v17, %v96_v15  ;;  %v240_v17 = vsub.s32 6, %v904_v5 }
 0x145   :  { %v111_v20 = vmul.f32 0.2, %v109_v18  ;;  %v104_v22 = vmul.f32 %v102_v11, %v98_v19 }
 0x147   :  { %v113_v23 = vmax.f32 %v109_v18, %v111_v20  ;;  %v110_v21 = vadd.f32 %v108_v14, %v104_v22  ;;  %v246_v18 = vsub.s32 7, %v904_v5  ;;  %v241_v20 = vrot.slane %v911_v8, %v240_v17 }
 0x149   :  { %644 = vmatprep.mubr.f32.mxu0 %v113_v23  ;;  %v112_v24 = vmul.f32 0.2, %v110_v21 }
 0x14b   :  { %v114_v26 = vmax.f32 %v110_v21, %v112_v24  ;;  %v247_v24 = vrot.slane %v911_v8, %v246_v18 }
 0x14d   :  { %645 = vmatmul.mubr.f32.vlgmr.msra.gmra.mrb[0].mxu0 %v114_v26 }
 0x220   :  { %v646_v29 = vpop.f32.mrb[0].mxu0 }
 0x221   :  { %v947_v25 = vadd.f32 %v646_v29, %v134_v28  ;;  %v201_v30 = vpop.f32.mrb[1].mxu0 }
 0x222   :  { %v949_v31 = vadd.f32 %v201_v30, %v134_v28 }
 0x223   :  { %212 = vadd.xlane.f32.xlu0 %v947_v25  ;;  %v217_v32 = vmul.f32 %v947_v25, %v947_v25 }
 0x224   :  { %210 = vadd.xlane.f32.xlu1 %v949_v31  ;;  %v216_v33 = vmul.f32 %v949_v31, %v949_v31 }
 0x227   :  { %220 = vadd.xlane.f32.xlu0 %v217_v32 }
 0x228   :  { %218 = vadd.xlane.f32.xlu1 %v216_v33 }
 0x2b0   :  { %v213_v58 = vpop.xlane.xlu0 %212 }
 0x2b1   :  { %v215_v59 = vmul.f32 0.0078125, %v213_v58  ;;  %v211_v60 = vpop.xlane.xlu1 %210  ;;  %v406_v58 = vld [vmem:[#allocation2 + $0x158] sm:$0xff] }
 0x2b2   :  { %v214_v61 = vmul.f32 0.0078125, %v211_v60  ;;  %v407_v60 = vld [vmem:[#allocation2 + $0x160] sm:$0xff] }
 0x2b3   :  { %v225_v63 = vmul.f32 %v215_v59, %v215_v59  ;;  %v235_v19 = vsub.f32 %v947_v25, %v215_v59  ;;  %v801_v59 = vpack.c.bf16 %v406_v58, %v405_v57 }
 0x2b4   :  { %v221_v62 = vpop.xlane.xlu0 %220  ;;  %v224_v2 = vmul.f32 %v214_v61, %v214_v61  ;;  %v234_v23 = vsub.f32 %v949_v31, %v214_v61  ;;  %v970_v31 = vld [vmem:[%s1015_s1 + $0x8] sm:$0xff] }
 0x2b5   :  { %v223_v0 = vmul.f32 0.0078125, %v221_v62  ;;  %v219_v1 = vpop.xlane.xlu1 %218  ;;  %v274_v8 = vrot.slane %v970_v31, %v44_v7  ;;  %v396_v7 = vld [vmem:[#allocation2 + $0x108] sm:$0xff] }
 0x2b6   :  { %v222_v10 = vmul.f32 0.0078125, %v219_v1  ;;  %v781_v44 = vpack.c.bf16 %v396_v7, %v395_v43  ;;  %v408_v61 = vld [vmem:[#allocation2 + $0x168] sm:$0xff] }
 0x2b7   :  { %v227_v11 = vsub.f32 %v223_v0, %v225_v63  ;;  %v805_v62 = vpack.c.bf16 %v408_v61, %v407_v60  ;;  %v409_v63 = vld [vmem:[#allocation2 + $0x170] sm:$0xff]  ;;  %v410_v0 = vld [vmem:[#allocation2 + $0x178] sm:$0xff] }
 0x2b8   :  { %v226_v12 = vsub.f32 %v222_v10, %v224_v2  ;;  %782 = vmatprep.subr.bf16.mxu0 %v781_v44  ;;  %v809_v1 = vpack.c.bf16 %v410_v0, %v409_v63  ;;  %v521_v63 = vrot.slane %v970_v31, %v107_v4 }
 0x2b9   :  { %v229_v13 = vmax.f32 %v227_v11, 0.0  ;;  %784 = vmatpush3.bf16.msra.mxu0 %v781_v44 }
 0x2ba   :  { %v228_v14 = vmax.f32 %v226_v12, 0.0  ;;  %786 = vmatprep.subr.bf16.mxu0 %v785_v47 }
 0x2bb   :  { %v231_v15 = vadd.f32 1e-05, %v229_v13 }
 0x2bc   :  { %v230_v16 = vadd.f32 1e-05, %v228_v14 }
 0x2bd   :  { %825 = vrsqrt.f32 %v231_v15  ;;  %788 = vmatpush3.bf16.msra.mxu0 %v785_v47 }
 0x2be   :  { %827 = vrsqrt.f32 %v230_v16  ;;  %790 = vmatprep.subr.bf16.mxu0 %v789_v50 }
 0x2c1   :  { %792 = vmatpush3.bf16.msra.mxu0 %v789_v50 }
 0x2c2   :  { %794 = vmatprep.subr.bf16.mxu0 %v793_v53 }
 0x2c5   :  { %796 = vmatpush3.bf16.msra.mxu0 %v793_v53 }
 0x2c6   :  { %798 = vmatprep.subr.bf16.mxu0 %v797_v56 }
 0x2c7   :  { %v826_v22 = vpop.eup %825 }
 0x2c8   :  { %v828_v21 = vpop.eup %827  ;;  %v237_v26 = vmul.f32 %v826_v22, %v235_v19 }
 0x2c9   :  { %v236_v28 = vmul.f32 %v828_v21, %v234_v23  ;;  %800 = vmatpush3.bf16.msra.mxu0 %v797_v56 }
 0x2ca   :  { %v243_v29 = vmul.f32 %v241_v20, %v237_v26  ;;  %802 = vmatprep.subr.bf16.mxu0 %v801_v59 }
 0x2cb   :  { %v242_v30 = vmul.f32 %v241_v20, %v236_v28 }
 0x2cc   :  { %v249_v32 = vadd.f32 %v247_v24, %v243_v29  ;;  %v381_v29 = vrot.slane %v970_v31, %v64_v6 }
 0x2cd   :  { %v248_v33 = vadd.f32 %v247_v24, %v242_v30  ;;  %804 = vmatpush3.bf16.msra.mxu0 %v801_v59 }
 0x2ce   :  { %v251_v34 = vmul.f32 0.2, %v249_v32  ;;  %806 = vmatprep.subr.bf16.mxu0 %v805_v62 }
 0x2cf   :  { %v250_v25 = vmul.f32 0.2, %v248_v33 }
 0x2d0   :  { %v253_v36 = vmax.f32 %v249_v32, %v251_v34 }
 0x2d1   :  { %v252_v35 = vmax.f32 %v248_v33, %v250_v25  ;;  %808 = vmatpush3.bf16.msra.mxu0 %v805_v62  ;;  %v387_v25 = vrot.slane %v970_v31, %v50_v9 }
 0x2d2   :  { %810 = vmatprep.subr.bf16.mxu0 %v809_v1 }
 0x2d3   :  { %679 = vmatprep.mubr.f32.mxu1 %v252_v35 }
 0x2d4   :  { %680 = vmatmul.mubr.f32.vlgmr.msra.gmra.mrb[0].mxu1 %v253_v36 }
 0x2d5   :  { %812 = vmatpush3.bf16.msra.mxu0 %v809_v1 }
 0x3a7   :  { %v681_v37 = vpop.f32.mrb[0].mxu1 }
 0x3a8   :  { %v975_v38 = vadd.f32 %v681_v37, %v274_v8  ;;  %v341_v39 = vpop.f32.mrb[1].mxu1 }
 0x3a9   :  { %v977_v40 = vadd.f32 %v341_v39, %v274_v8 }
 0x3aa   :  { %352 = vadd.xlane.f32.xlu0 %v975_v38  ;;  %v357_v41 = vmul.f32 %v975_v38, %v975_v38 }
 0x3ab   :  { %350 = vadd.xlane.f32.xlu1 %v977_v40  ;;  %v356_v42 = vmul.f32 %v977_v40, %v977_v40 }
 0x3ae   :  { %360 = vadd.xlane.f32.xlu0 %v357_v41 }
 0x3af   :  { %358 = vadd.xlane.f32.xlu1 %v356_v42 }
 0x437   :  { %v353_v2 = vpop.xlane.xlu0 %352 }
 0x438   :  { %v355_v10 = vmul.f32 0.0078125, %v353_v2  ;;  %v351_v11 = vpop.xlane.xlu1 %350 }
 0x439   :  { %v354_v12 = vmul.f32 0.0078125, %v351_v11  ;;  %v527_v11 = vrot.slane %v970_v31, %v133_v27  ;;  %v547_v27 = vrot.slane %v970_v31, %v246_v18 }
 0x43a   :  { %v365_v14 = vmul.f32 %v355_v10, %v355_v10  ;;  %v375_v30 = vsub.f32 %v975_v38, %v355_v10  ;;  %v414_v38 = vrot.slane %v970_v31, %v101_v3 }
 0x43b   :  { %v361_v13 = vpop.xlane.xlu0 %360  ;;  %v364_v19 = vmul.f32 %v354_v12, %v354_v12  ;;  %v374_v33 = vsub.f32 %v977_v40, %v354_v12 }
 0x43c   :  { %v363_v15 = vmul.f32 0.0078125, %v361_v13  ;;  %v359_v16 = vpop.xlane.xlu1 %358 }
 0x43d   :  { %v362_v20 = vmul.f32 0.0078125, %v359_v16 }
 0x43e   :  { %v367_v22 = vsub.f32 %v363_v15, %v365_v14 }
 0x43f   :  { %v366_v23 = vsub.f32 %v362_v20, %v364_v19 }
 0x440   :  { %v369_v21 = vmax.f32 %v367_v22, 0.0  ;;  %v537_v22 = vrot.slane %v970_v31, %v240_v17 }
 0x441   :  { %v368_v24 = vmax.f32 %v366_v23, 0.0 }
 0x442   :  { %v371_v26 = vadd.f32 1e-05, %v369_v21 }
 0x443   :  { %v370_v28 = vadd.f32 1e-05, %v368_v24 }
 0x444   :  { %829 = vrsqrt.f32 %v371_v26 }
 0x445   :  { %831 = vrsqrt.f32 %v370_v28 }
 0x44e   :  { %v830_v32 = vpop.eup %829 }
 0x44f   :  { %v832_v34 = vpop.eup %831  ;;  %v377_v35 = vmul.f32 %v830_v32, %v375_v30 }
 0x450   :  { %v376_v36 = vmul.f32 %v832_v34, %v374_v33 }
 0x451   :  { %v383_v8 = vmul.f32 %v381_v29, %v377_v35 }
 0x452   :  { %v382_v37 = vmul.f32 %v381_v29, %v376_v36 }
 0x453   :  { %v389_v39 = vadd.f32 %v387_v25, %v383_v8 }
 0x454   :  { %v388_v41 = vadd.f32 %v387_v25, %v382_v37 }
 0x455   :  { %v391_v42 = vmul.f32 0.2, %v389_v39 }
 0x456   :  { %v390_v43 = vmul.f32 0.2, %v388_v41 }
 0x457   :  { %v393_v6 = vmax.f32 %v389_v39, %v391_v42 }
 0x458   :  { %v392_v7 = vmax.f32 %v388_v41, %v390_v43 }
 0x45a   :  { %714 = vmatprep.mubr.f32.mxu0 %v392_v7 }
 0x45b   :  { %715 = vmatmul.mubr.f32.vlgmr.msra.gmra.mrb[2].mxu0 %v393_v6 }
 0x52e   :  { %v716_v40 = vpop.f32.mrb[2].mxu0 }
 0x52f   :  { %v487_v44 = vadd.f32 %v716_v40, %v414_v38  ;;  %v481_v45 = vpop.f32.mrb[3].mxu0 }
 0x530   :  { %v482_v9 = vadd.f32 %v481_v45, %v414_v38 }
 0x531   :  { %492 = vadd.xlane.f32.xlu0 %v487_v44  ;;  %v497_v46 = vmul.f32 %v487_v44, %v487_v44 }
 0x532   :  { %490 = vadd.xlane.f32.xlu1 %v482_v9  ;;  %v496_v47 = vmul.f32 %v482_v9, %v482_v9 }
 0x535   :  { %500 = vadd.xlane.f32.xlu0 %v497_v46 }
 0x536   :  { %498 = vadd.xlane.f32.xlu1 %v496_v47 }
 0x5be   :  { %v493_v48 = vpop.xlane.xlu0 %492 }
 0x5bf   :  { %v495_v49 = vmul.f32 0.0078125, %v493_v48  ;;  %v491_v50 = vpop.xlane.xlu1 %490 }
 0x5c0   :  { %v494_v51 = vmul.f32 0.0078125, %v491_v50 }
 0x5c1   :  { %v505_v53 = vmul.f32 %v495_v49, %v495_v49  ;;  %v515_v0 = vsub.f32 %v487_v44, %v495_v49 }
 0x5c2   :  { %v501_v52 = vpop.xlane.xlu0 %500  ;;  %v504_v56 = vmul.f32 %v494_v51, %v494_v51  ;;  %v514_v2 = vsub.f32 %v482_v9, %v494_v51 }
 0x5c3   :  { %v503_v54 = vmul.f32 0.0078125, %v501_v52  ;;  %v499_v55 = vpop.xlane.xlu1 %498 }
 0x5c4   :  { %v502_v3 = vmul.f32 0.0078125, %v499_v55 }
 0x5c5   :  { %v507_v57 = vsub.f32 %v503_v54, %v505_v53 }
 0x5c6   :  { %v506_v58 = vsub.f32 %v502_v3, %v504_v56 }
 0x5c7   :  { %v509_v59 = vmax.f32 %v507_v57, 0.0 }
 0x5c8   :  { %v508_v60 = vmax.f32 %v506_v58, 0.0 }
 0x5c9   :  { %v511_v61 = vadd.f32 1e-05, %v509_v59 }
 0x5ca   :  { %v510_v62 = vadd.f32 1e-05, %v508_v60 }
 0x5cb   :  { %833 = vrsqrt.f32 %v511_v61 }
 0x5cc   :  { %835 = vrsqrt.f32 %v510_v62 }
 0x5d5   :  { %v834_v1 = vpop.eup %833 }
 0x5d6   :  { %v836_v10 = vpop.eup %835  ;;  %v517_v12 = vmul.f32 %v834_v1, %v515_v0 }
 0x5d7   :  { %v516_v13 = vmul.f32 %v836_v10, %v514_v2 }
 0x5d8   :  { %v523_v14 = vmul.f32 %v521_v63, %v517_v12 }
 0x5d9   :  { %v522_v15 = vmul.f32 %v521_v63, %v516_v13 }
 0x5da   :  { %v529_v16 = vadd.f32 %v527_v11, %v523_v14 }
 0x5db   :  { %v528_v19 = vadd.f32 %v527_v11, %v522_v15 }
 0x5dc   :  { %v531_v20 = vmul.f32 0.2, %v529_v16 }
 0x5dd   :  { %v530_v4 = vmul.f32 0.2, %v528_v19 }
 0x5de   :  { %v533_v23 = vmax.f32 %v529_v16, %v531_v20 }
 0x5df   :  { %v532_v21 = vmax.f32 %v528_v19, %v530_v4 }
 0x5e0   :  { %v539_v24 = vmul.f32 %v537_v22, %v533_v23 }
 0x5e1   :  { %v538_v26 = vmul.f32 %v537_v22, %v532_v21 }
 0x5e2   :  { %542 = vadd.xlane.f32.xlu0 %v539_v24 }
 0x5e3   :  { %540 = vadd.xlane.f32.xlu1 %v538_v26 }
 0x66f   :  { %v543_v28 = vpop.xlane.xlu0 %542 }
 0x670   :  { %v549_v29 = vadd.f32 %v547_v27, %v543_v28  ;;  %v541_v30 = vpop.xlane.xlu1 %540 }
 0x671   :  { %v548_v32 = vadd.f32 %v547_v27, %v541_v30 }
 0x672   :  { %552 = vst.msk [vmem:[%s1017_s3 + $0x8] sm:$0xff] %vm550_vm0, %v549_v29 }
 0x673   :  { %551 = vst.msk [vmem:[%s1017_s3] sm:$0xff] %vm550_vm0, %v548_v32 }
 0x674   :  { %557 = vsyncpa [#allocation3], 1 }

</bundles_post_ra>
